<compile_context>
chip_gen: v7x
topology: tpu7x:2x2x1
jax: 0.10.0
libtpu: 0.0.40
codegen_flags: <defaults>
</compile_context>

<pallas_src>
import jax
import jax.numpy as jnp
from jax import lax
from jax.experimental import pallas as pl
from jax.experimental.pallas import tpu as pltpu


# ----------------------------------------------------------------------------
# Kernels
# ----------------------------------------------------------------------------
def _kv_proj_kernel(x_ref, wk_ref, bk_ref, wv_ref, bv_ref, k_ref, v_ref):
    """Project one [TN, C] slab of x into bf16 K ([TN, C8P]) and V ([TN, C])."""
    xf = x_ref[...].astype(jnp.float32)                                    # [TN, C]
    k = jnp.dot(xf, wk_ref[...], preferred_element_type=jnp.float32) + bk_ref[...]
    v = jnp.dot(xf, wv_ref[...], preferred_element_type=jnp.float32) + bv_ref[...]
    k_ref[...] = k.astype(k_ref.dtype)                                     # bf16
    v_ref[...] = v.astype(v_ref.dtype)                                     # bf16


def _attn_kernel(x_ref, k_ref, v_ref, wq_ref, bq_ref, gamma_ref,
                 out_ref, attn_ref=None):
    """One query tile of SAGAN attention (K/V for the batch element are inputs)."""
    xq = x_ref[...].astype(jnp.float32)                                    # [TQ, C]

    # Query projection for this tile (C/8 zero-padded to 128 lanes; exact).
    q = (jnp.dot(xq, wq_ref[...], preferred_element_type=jnp.float32)
         + bq_ref[...])                                                    # [TQ, C8P]

    # energy[i, j] = <q_i, k_j>; bf16 operands (MXU native), f32 accumulation.
    energy = lax.dot_general(q.astype(jnp.bfloat16), k_ref[...],
                             (((1,), (1,)), ((), ())),
                             preferred_element_type=jnp.float32)           # [TQ, N]

    # Numerically-stable softmax over keys (torch dim=2); EUP approx reciprocal.
    # TODO(synk): on v6e/v7x the exp could run in bf16 (~2x EUP throughput);
    # kept in f32 so the same kernel stays accurate on v5e (no bf16 EUP).
    m = jnp.max(energy, axis=-1, keepdims=True)
    e = jnp.exp(energy - m)
    attn = e * pl.reciprocal(jnp.sum(e, axis=-1, keepdims=True), approx=True)

    # out = attn @ V with bf16 operands (f32 accumulation), gamma-scaled residual.
    o = jnp.dot(attn.astype(jnp.bfloat16), v_ref[...],
                preferred_element_type=jnp.float32)                        # [TQ, C]
    out_ref[...] = (xq + gamma_ref[0] * o).astype(out_ref.dtype)
    if attn_ref is not None:
        attn_ref[...] = attn.astype(attn_ref.dtype)


# ----------------------------------------------------------------------------
# Host-side helpers
# ----------------------------------------------------------------------------
def _round_up(x, m):
    return ((x + m - 1) // m) * m


def _vmem_budget_bytes():
    """Physical VMEM of the attached chip minus ~8 MiB headroom (v7x-safe fallback)."""
    cap = 64 * 1024 * 1024
    try:
        cap = int(pltpu.get_tpu_info().vmem_capacity_bytes)
    except Exception:
        pass
    return max(cap - 8 * 1024 * 1024, 24 * 1024 * 1024)


def _pick_q_tile(n, c, c8p, attn_itemsize, budget):
    """Largest lane-aligned query tile whose working set fits the VMEM budget."""
    cap = 512 if budget >= 80 * 1024 * 1024 else 256   # 512 on 128-MiB parts, 256 on v7x
    cands = [t for t in (512, 256, 128) if t <= cap and n % t == 0 and n // t >= 2]
    # Resident terms independent of the query tile (double-buffered inputs).
    fixed = 2 * n * (c8p + c) * 2 + 2 * (c * c8p + c8p) * 4     # K, V (bf16), Wq, bq
    for t in cands:
        per_tile = (2 * t * c * 4 * 2               # x + out blocks
                    + 2 * t * n * attn_itemsize     # attention-map output block
                    + 4 * t * n * 4)                # f32 energy/exp/attn intermediates
        if fixed + per_tile <= budget:
            return t
    if cands:
        return cands[-1]      # smallest aligned tile; let the compiler rebuffer
    return n                  # odd N fallback: single tile per batch element


# ----------------------------------------------------------------------------
# Forward wrapper
# ----------------------------------------------------------------------------
def self_attn_gan_forward(x_nchw, params, *, attn_dtype=jnp.bfloat16,
                          return_attention=True):
    """Pallas implementation of Self_Attn_GAN.forward.

    Returns (out_nchw, attention) by default (matching the torch module); with
    return_attention=False only out_nchw is returned and the O(N^2) attention
    writeback is skipped entirely.
    """
    wq, bq, wk, bk, wv, bv, gamma = params
    B, C, H, W = x_nchw.shape
    N = H * W
    C8 = wq.shape[0]
    C8P = _round_up(max(C8, 128), 128)          # pad the tiny C/8 axis to 128 lanes

    budget = _vmem_budget_bytes()
    attn_isz = jnp.dtype(attn_dtype).itemsize if return_attention else 0
    TQ = _pick_q_tile(N, C, C8P, attn_isz, budget)
    n_q = N // TQ

    # NCHW -> [B, N, C] (channels-last for the attention math).
    x_bnc = jnp.transpose(x_nchw, (0, 2, 3, 1)).reshape(B, N, C)

    # 1x1 convs == channel matmuls: [C_out, C_in, 1, 1] -> [C_in, C_out],
    # zero-padded along the C/8 output axis (exact).
    def _prep(w, b, pad_to):
        co = w.shape[0]
        wt = jnp.pad(w.reshape(co, C).T, ((0, 0), (0, pad_to - co)))
        bt = jnp.pad(b.reshape(1, co), ((0, 0), (0, pad_to - co)))
        return wt.astype(jnp.float32), bt.astype(jnp.float32)

    wq_p, bq_p = _prep(wq, bq, C8P)
    wk_p, bk_p = _prep(wk, bk, C8P)
    wv_t = wv.reshape(C, C).T.astype(jnp.float32)
    bv_2 = bv.reshape(1, C).astype(jnp.float32)
    gamma_s = gamma.reshape(1).astype(jnp.float32)

    # ---- Stage 1: K/V projection (fully parallel, off the attention critical path).
    TN = TQ
    n_n = N // TN
    k_bf, v_bf = pl.pallas_call(
        _kv_proj_kernel,
        out_shape=(
            jax.ShapeDtypeStruct((B, N, C8P), jnp.bfloat16),
            jax.ShapeDtypeStruct((B, N, C), jnp.bfloat16),
        ),
        grid_spec=pltpu.PrefetchScalarGridSpec(
            num_scalar_prefetch=0,
            grid=(B, n_n),
            in_specs=[
                pl.BlockSpec((pl.Squeezed(), TN, C), lambda b, n: (b, n, 0)),   # x slab
                pl.BlockSpec((C, C8P), lambda b, n: (0, 0)),                    # Wk^T (padded)
                pl.BlockSpec((1, C8P), lambda b, n: (0, 0)),                    # bk (padded)
                pl.BlockSpec((C, C), lambda b, n: (0, 0)),                      # Wv^T
                pl.BlockSpec((1, C), lambda b, n: (0, 0)),                      # bv
            ],
            out_specs=[
                pl.BlockSpec((pl.Squeezed(), TN, C8P), lambda b, n: (b, n, 0)),
                pl.BlockSpec((pl.Squeezed(), TN, C), lambda b, n: (b, n, 0)),
            ],
        ),
        compiler_params=pltpu.CompilerParams(
            dimension_semantics=("parallel", "parallel")),
    )(x_bnc, wk_p, bk_p, wv_t, bv_2)

    # ---- Stage 2: attention over query tiles (both grid axes parallel).
    est = (2 * TQ * C * 4                 # x block
           + 2 * N * C8P * 2              # K block (bf16)
           + 2 * N * C * 2                # V block (bf16)
           + 2 * (C * C8P + C8P) * 4      # Wq, bq
           + 2 * TQ * C * 4               # out block
           + 2 * TQ * N * attn_isz        # attn block (0 if skipped)
           + 4 * TQ * N * 4)              # f32 energy/exp/attn intermediates
    vmem_limit = min(max(int(est * 1.25), 32 * 1024 * 1024), budget)

    out_shapes = [jax.ShapeDtypeStruct((B, N, C), x_nchw.dtype)]
    out_specs = [pl.BlockSpec((pl.Squeezed(), TQ, C), lambda b, q: (b, q, 0))]
    if return_attention:
        out_shapes.append(jax.ShapeDtypeStruct((B, N, N), attn_dtype))
        out_specs.append(pl.BlockSpec((pl.Squeezed(), TQ, N), lambda b, q: (b, q, 0)))
        # TODO(synk): for very large N with no consumer of the map, a flash-style
        # online-softmax over key tiles would also drop the [TQ, N] intermediate.

    results = pl.pallas_call(
        _attn_kernel,
        out_shape=tuple(out_shapes),
        grid_spec=pltpu.PrefetchScalarGridSpec(
            num_scalar_prefetch=0,
            grid=(B, n_q),
            in_specs=[
                pl.BlockSpec((pl.Squeezed(), TQ, C), lambda b, q: (b, q, 0)),   # x q-tile
                pl.BlockSpec((pl.Squeezed(), N, C8P), lambda b, q: (b, 0, 0)),  # K (full, bf16)
                pl.BlockSpec((pl.Squeezed(), N, C), lambda b, q: (b, 0, 0)),    # V (full, bf16)
                pl.BlockSpec((C, C8P), lambda b, q: (0, 0)),                    # Wq^T (padded)
                pl.BlockSpec((1, C8P), lambda b, q: (0, 0)),                    # bq (padded)
                pl.BlockSpec(memory_space=pltpu.MemorySpace.SMEM),              # gamma scalar
            ],
            out_specs=out_specs,
        ),
        compiler_params=pltpu.CompilerParams(
            dimension_semantics=("parallel", "parallel"),
            vmem_limit_bytes=vmem_limit,
        ),
    )(x_bnc, k_bf, v_bf, wq_p, bq_p, gamma_s)

    if return_attention:
        out_bnc, attn = results
    else:
        out_bnc = results[0] if isinstance(results, (tuple, list)) else results
        attn = None

    # [B, N, C] -> NCHW (matches rearrange 'b (h w) c -> b c h w').
    out_nchw = jnp.transpose(out_bnc.reshape(B, H, W, C), (0, 3, 1, 2))
    return (out_nchw, attn) if return_attention else out_nchw


# ----------------------------------------------------------------------------
# Pure-JAX reference + parameter init (test harness)
# ----------------------------------------------------------------------------
def _reference_forward(x_nchw, params):
    """Pure-JAX reference matching the PyTorch forward semantics."""
    wq, bq, wk, bk, wv, bv, gamma = params
    B, C, H, W = x_nchw.shape
    N = H * W
    x_bnc = jnp.transpose(x_nchw, (0, 2, 3, 1)).reshape(B, N, C)
    q = x_bnc @ wq.reshape(-1, C).T + bq
    k = x_bnc @ wk.reshape(-1, C).T + bk
    v = x_bnc @ wv.reshape(C, C).T + bv
    energy = jnp.einsum('bnc,bmc->bnm', q, k)
    attn = jax.nn.softmax(energy, axis=-1)
    o = jnp.einsum('bnm,bmc->bnc', attn, v)
    out = x_bnc + gamma[0] * o
    return jnp.transpose(out.reshape(B, H, W, C), (0, 3, 1, 2)), attn


def init_params(key, in_dim):
    c8 = in_dim // 8
    ks = jax.random.split(key, 6)
    scale = 1.0 / jnp.sqrt(jnp.float32(in_dim))
    wq = jax.random.uniform(ks[0], (c8, in_dim, 1, 1), jnp.float32, -scale, scale)
    bq = jax.random.uniform(ks[1], (c8,), jnp.float32, -scale, scale)
    wk = jax.random.uniform(ks[2], (c8, in_dim, 1, 1), jnp.float32, -scale, scale)
    bk = jax.random.uniform(ks[3], (c8,), jnp.float32, -scale, scale)
    wv = jax.random.uniform(ks[4], (in_dim, in_dim, 1, 1), jnp.float32, -scale, scale)
    bv = jax.random.uniform(ks[5], (in_dim,), jnp.float32, -scale, scale)
    gamma = jnp.zeros((1,), jnp.float32)   # nn.Parameter(torch.zeros([1]))
    return (wq, bq, wk, bk, wv, bv, gamma)


if __name__ == "__main__":
    key = jax.random.PRNGKey(0)
    k_x, k_p = jax.random.split(key)

    B, in_dim, H, W = 2, 32, 16, 16          # N = 256 -> two query tiles of 128
    x = jax.random.normal(k_x, (B, in_dim, H, W), jnp.float32)
    params = init_params(k_p, in_dim)
    # The module initializes gamma to 0; use a nonzero value so the residual
    # path is actually exercised by the check (forward semantics unchanged).
    params = params[:-1] + (jnp.full((1,), 0.3, jnp.float32),)

    out, attn = self_attn_gan_forward(x, params)           # attn in bf16 (default)
    out, attn = jax.block_until_ready((out, attn))

    out_ref, attn_ref = _reference_forward(x, params)
    # bf16 q/k energy, bf16 V/attn operands, bf16 attn map, approx reciprocal
    # -> tolerances loosened accordingly (GAN-attention accuracy regime).
    assert jnp.allclose(out, out_ref, atol=1e-2, rtol=1e-2), "output mismatch"
    assert jnp.allclose(attn.astype(jnp.float32), attn_ref,
                        atol=3e-3, rtol=3e-2), "attention mismatch"

    # Fast path: no attention-map output (drops the O(N^2) HBM writeback).
    out_only = self_attn_gan_forward(x, params, return_attention=False)
    out_only = jax.block_until_ready(out_only)
    assert jnp.allclose(out_only, out_ref, atol=1e-2, rtol=1e-2), \
        "fast-path output mismatch"

    print("KERNEL_OK")
</pallas_src>

<mosaic_0001>
module attributes {stable_mosaic.version = 11 : i64} {
  func.func @_kv_proj_kernel(%arg0: i32, %arg1: i32, %arg2: memref<1x128x32xf32, #tpu.memory_space<vmem>>, %arg3: memref<32x128xf32, #tpu.memory_space<vmem>>, %arg4: memref<1x128xf32, #tpu.memory_space<vmem>>, %arg5: memref<32x32xf32, #tpu.memory_space<vmem>>, %arg6: memref<1x32xf32, #tpu.memory_space<vmem>>, %arg7: memref<1x128x128xbf16, #tpu.memory_space<vmem>>, %arg8: memref<1x128x32xbf16, #tpu.memory_space<vmem>>) attributes {dimension_semantics = [#tpu.dimension_semantics<parallel>, #tpu.dimension_semantics<parallel>], iteration_bounds = array<i64: 2, 2>, scalar_prefetch = 0 : i64, scratch_operands = 0 : i64, tpu.core_type = #tpu.core_type<tc>, window_params = [{transform_indices = @transform_0, window_bounds = array<i64: 1, 128, 32>}, {pipeline_mode = #tpu.pipeline_mode<synchronous>, transform_indices = @transform_1, window_bounds = array<i64: 32, 128>}, {pipeline_mode = #tpu.pipeline_mode<synchronous>, transform_indices = @transform_2, window_bounds = array<i64: 1, 128>}, {pipeline_mode = #tpu.pipeline_mode<synchronous>, transform_indices = @transform_3, window_bounds = array<i64: 32, 32>}, {pipeline_mode = #tpu.pipeline_mode<synchronous>, transform_indices = @transform_4, window_bounds = array<i64: 1, 32>}, {transform_indices = @transform_5, window_bounds = array<i64: 1, 128, 128>}, {transform_indices = @transform_6, window_bounds = array<i64: 1, 128, 32>}]} {
    %c0 = arith.constant 0 : index
    %c0_0 = arith.constant 0 : index
    %c0_1 = arith.constant 0 : index
    %0 = vector.load %arg2[%c0, %c0_0, %c0_1] : memref<1x128x32xf32, #tpu.memory_space<vmem>>, vector<1x128x32xf32>
    %1 = vector.shape_cast %0 : vector<1x128x32xf32> to vector<128x32xf32>
    %c0_2 = arith.constant 0 : index
    %c0_3 = arith.constant 0 : index
    %2 = vector.load %arg3[%c0_2, %c0_3] : memref<32x128xf32, #tpu.memory_space<vmem>>, vector<32x128xf32>
    %cst = arith.constant dense<0.000000e+00> : vector<128x128xf32>
    %3 = tpu.matmul %1, %2, %cst {dimension_numbers = #tpu.dot_dimension_numbers<[1], [0], [0], [1], [0, 0, 1, 1], [], []>} : vector<128x32xf32>, vector<32x128xf32>, vector<128x128xf32> -> vector<128x128xf32>
    %c0_4 = arith.constant 0 : index
    %c0_5 = arith.constant 0 : index
    %4 = vector.load %arg4[%c0_4, %c0_5] : memref<1x128xf32, #tpu.memory_space<vmem>>, vector<1x128xf32>
    %5 = vector.broadcast %4 : vector<1x128xf32> to vector<128x128xf32>
    %6 = arith.addf %3, %5 : vector<128x128xf32>
    %c0_6 = arith.constant 0 : index
    %c0_7 = arith.constant 0 : index
    %7 = vector.load %arg5[%c0_6, %c0_7] : memref<32x32xf32, #tpu.memory_space<vmem>>, vector<32x32xf32>
    %cst_8 = arith.constant dense<0.000000e+00> : vector<128x32xf32>
    %8 = tpu.matmul %1, %7, %cst_8 {dimension_numbers = #tpu.dot_dimension_numbers<[1], [0], [0], [1], [0, 0, 1, 1], [], []>} : vector<128x32xf32>, vector<32x32xf32>, vector<128x32xf32> -> vector<128x32xf32>
    %c0_9 = arith.constant 0 : index
    %c0_10 = arith.constant 0 : index
    %9 = vector.load %arg6[%c0_9, %c0_10] : memref<1x32xf32, #tpu.memory_space<vmem>>, vector<1x32xf32>
    %10 = vector.broadcast %9 : vector<1x32xf32> to vector<128x32xf32>
    %11 = arith.addf %8, %10 : vector<128x32xf32>
    %12 = arith.truncf %6 : vector<128x128xf32> to vector<128x128xbf16>
    %c0_11 = arith.constant 0 : index
    %c0_12 = arith.constant 0 : index
    %c0_13 = arith.constant 0 : index
    %13 = vector.load %arg7[%c0_11, %c0_12, %c0_13] : memref<1x128x128xbf16, #tpu.memory_space<vmem>>, vector<1x128x128xbf16>
    %14 = vector.shape_cast %13 : vector<1x128x128xbf16> to vector<128x128xbf16>
    %15 = vector.shape_cast %12 : vector<128x128xbf16> to vector<1x128x128xbf16>
    tpu.vector_store %arg7[%c0_11, %c0_12, %c0_13], %15 {strides = array<i32>} : memref<1x128x128xbf16, #tpu.memory_space<vmem>>, vector<1x128x128xbf16>,
    %16 = arith.truncf %11 : vector<128x32xf32> to vector<128x32xbf16>
    %c0_14 = arith.constant 0 : index
    %c0_15 = arith.constant 0 : index
    %c0_16 = arith.constant 0 : index
    %17 = vector.load %arg8[%c0_14, %c0_15, %c0_16] : memref<1x128x32xbf16, #tpu.memory_space<vmem>>, vector<1x128x32xbf16>
    %18 = vector.shape_cast %17 : vector<1x128x32xbf16> to vector<128x32xbf16>
    %19 = vector.shape_cast %16 : vector<128x32xbf16> to vector<1x128x32xbf16>
    tpu.vector_store %arg8[%c0_14, %c0_15, %c0_16], %19 {strides = array<i32>} : memref<1x128x32xbf16, #tpu.memory_space<vmem>>, vector<1x128x32xbf16>,
    return
  }
  func.func @transform_0(%arg0: i32, %arg1: i32) -> (i32, i32, i32) {
    %c0_i32 = arith.constant 0 : i32
    %c0_i32_0 = arith.constant 0 : i32
    return %arg0, %arg1, %c0_i32 : i32, i32, i32
  }
  func.func @transform_1(%arg0: i32, %arg1: i32) -> (i32, i32) {
    %c0_i32 = arith.constant 0 : i32
    %c0_i32_0 = arith.constant 0 : i32
    %c0_i32_1 = arith.constant 0 : i32
    return %c0_i32, %c0_i32_0 : i32, i32
  }
  func.func @transform_2(%arg0: i32, %arg1: i32) -> (i32, i32) {
    %c0_i32 = arith.constant 0 : i32
    %c0_i32_0 = arith.constant 0 : i32
    %c0_i32_1 = arith.constant 0 : i32
    return %c0_i32, %c0_i32_0 : i32, i32
  }
  func.func @transform_3(%arg0: i32, %arg1: i32) -> (i32, i32) {
    %c0_i32 = arith.constant 0 : i32
    %c0_i32_0 = arith.constant 0 : i32
    %c0_i32_1 = arith.constant 0 : i32
    return %c0_i32, %c0_i32_0 : i32, i32
  }
  func.func @transform_4(%arg0: i32, %arg1: i32) -> (i32, i32) {
    %c0_i32 = arith.constant 0 : i32
    %c0_i32_0 = arith.constant 0 : i32
    %c0_i32_1 = arith.constant 0 : i32
    return %c0_i32, %c0_i32_0 : i32, i32
  }
  func.func @transform_5(%arg0: i32, %arg1: i32) -> (i32, i32, i32) {
    %c0_i32 = arith.constant 0 : i32
    %c0_i32_0 = arith.constant 0 : i32
    return %arg0, %arg1, %c0_i32 : i32, i32, i32
  }
  func.func @transform_6(%arg0: i32, %arg1: i32) -> (i32, i32, i32) {
    %c0_i32 = arith.constant 0 : i32
    %c0_i32_0 = arith.constant 0 : i32
    return %arg0, %arg1, %c0_i32 : i32, i32, i32
  }
}

</mosaic_0001>

<bundles_post_ra>
// kernel: tpu_custom_call.1
= control target key start
LH: loop header
LB: loop body
LE: loop exit
PB: predicated region body
PF: predicated region fallthrough
CT: control target
= control target key end

     0   :  { %12 = vsyncpa [#allocation3], 0  ;;  %s1796_s0 = inlined_call_operand.vmem [shape: f32[2,256,32], index: 0, kind: input, shape index: {}]   ;;  %s1797_s1 = inlined_call_operand.vmem [shape: f32[32,128], index: 1, kind: input, shape index: {}]   ;;  %s1798_s2 = inlined_call_operand.vmem [shape: f32[1,128], index: 2, kind: input, shape index: {}]   ;;  %s1799_s3 = inlined_call_operand.vmem [shape: f32[32,32], index: 3, kind: input, shape index: {}]   ;;  %s1800_s4 = inlined_call_operand.vmem [shape: f32[1,32], index: 4, kind: input, shape index: {}]   ;;  %s1801_s5 = inlined_call_operand.hbm [shape: bf16[2,256,128], index: 5, kind: output, shape index: {0}]   ;;  %s1802_s6 = inlined_call_operand.vmem [shape: bf16[2,256,32], index: 6, kind: output, shape index: {1}]  }
   0x1   :  { %14 = vsyncpa [#allocation3 + $0x1], 0  ;;  %s1481_s21 = smov 0   ;;  %s1483_s22 = smov 0  }
   0x2   :  { %s1485_s23 = smov 0   ;;  %s1487_s24 = smov 0  }
   0x3   :  { %s1489_s25 = smov 0   ;;  %s1491_s26 = smov 0  }
   0x4   :  { %s1493_s27 = smov 0   ;;  %s1495_s28 = smov 0  }
   0x5 LB: > { %s991_s29 = sadd.s32 4294967295, %s1441_s28   ;;  %s992_s30 = sadd.s32 4294967294, %s1441_s28   ;;  %s1441_s28 = sphi %s1495_s28, %s20_s28   ;;  %s1437_s27 = sphi %s1493_s27, %s1811_s27   ;;  %s1433_s26 = sphi %s1491_s26, %s1810_s26   ;;  %s1429_s25 = sphi %s1489_s25, %s1809_s25   ;;  %s1425_s24 = sphi %s1487_s24, %s1808_s24   ;;  %s1421_s23 = sphi %s1485_s23, %s1807_s23   ;;  %s1417_s22 = sphi %s1483_s22, %s1806_s22   ;;  %s1413_s21 = sphi %s1481_s21, %s1805_s21  }
   0x6   : > { %s29_s7 = sadd.s32 1, %s1433_s26  ;;  %s32_s8 = sadd.s32 1, %s1437_s27 }
   0x7   : > { %p30_p0 = scmp.ge.s32.totalorder %s29_s7, 2  ;;  %p163_p1 = scmp.ne.s32.totalorder %s1421_s23, %s1417_s22 }
   0x8   : > { %p164_p2 = scmp.eq.s32.totalorder %s991_s29, 3  ;;  %p169_p5 = scmp.ne.s32.totalorder %s1417_s22, %s1413_s21 }
   0x9   : > { %s1813_s7 = smov (%p30_p0, %s29_s7), 0  ;;  %s1815_s8 = smov (!%p30_p0, %s32_s8), %s1437_s27 }
   0xa   : > { %s149_s9 = ssub.s32 %s1433_s26, %s1813_s7  ;;  %p1532_p3 = por %p164_p2, %p163_p1 }
   0xb   : > { %p34_p4 = scmp.ge.s32.totalorder %s1815_s8, 2  ;;  %p170_p6 = scmp.eq.s32.totalorder %s992_s30, 3 }
   0xc   : > { %p995_p7 = scmp.ge.s32.totalorder %s1441_s28, 1  ;;  %p241_p9 = scmp.lt.s32.totalorder %s1441_s28, 5 }
   0xd   : > { %s1817_s8 = smov (%p34_p4, %s1815_s8), 0  ;;  %p1541_p8 = por %p170_p6, %p169_p5 }
   0xe   : > { %s148_s12 = ssub.s32 %s1437_s27, %s1817_s8  ;;  %s153_s13 = sadd.s32 1, %s1421_s23 }
   0xf   : > { %s150_s14 = sor.u32 %s149_s9, %s148_s12  ;;  %p242_p10 = pnand %p995_p7, %p241_p9 }
  0x10   : > { %p151_p11 = scmp.eq.s32.totalorder %s150_s14, 0  ;;  %v321_v0 = vld [vmem:[%s1797_s1] sm:$0xff] (!%p242_p10)  ;;  %v322_v1 = vld [vmem:[%s1797_s1 + $0x8] sm:$0xff] (!%p242_p10)  ;;  %s1562_s30 = sshll.u32 (!%p242_p10), %s1425_s24, 4  ;;  %v323_v5 = vld [vmem:[%s1797_s1 + $0x10] sm:$0xff] (!%p242_p10)  ;;  %vm332_vm0 = vcmask (!%p242_p10), 261120  }
  0x11   : > { %245 = sbr.rel (%p242_p10) target bundleno = 292 (0x124), region = 40  ;;  %v526_v2 = vld [vmem:[%s1799_s3] sm:$0xff] (!%p242_p10)  ;;  %p285_p12 = scmp.lt.s32.totalorder (!%p242_p10), %s1429_s25, 1  ;;  %v1258_v3 = vpack.c.bf16 (!%p242_p10), %v322_v1, %v321_v0  ;;  %v527_v4 = vld [vmem:[%s1799_s3 + $0x8] sm:$0xff] (!%p242_p10)  ;;  %v324_v6 = vld [vmem:[%s1797_s1 + $0x18] sm:$0xff] (!%p242_p10)  ;;  %vm826_vm1 = vcmask (!%p242_p10), 257024  }
  0x12   : > { %s1550_s15 = scalar_select %p151_p11, %s1421_s23, %s153_s13  }
  0x13   : > { %p287_p13 = scmp.lt.s32.totalorder (!%p242_p10), %s1562_s30, 31  ;;  %v1266_v7 = vpack.c.bf16 (!%p242_p10), %v527_v4, %v526_v2  ;;  %v1262_v8 = vpack.c.bf16 (!%p242_p10), %v324_v6, %v323_v5  ;;  %v528_v9 = vld [vmem:[%s1799_s3 + $0x10] sm:$0xff] (!%p242_p10)  ;;  %v529_v10 = vld [vmem:[%s1799_s3 + $0x18] sm:$0xff] (!%p242_p10)  ;;  %1259 = vmatprep.subr.bf16.mxu0 (!%p242_p10), %v1258_v3  ;;  %s270_s18 = sand.u32 (!%p242_p10), 1, %s1417_s22   ;;  %v1643_v28 = vld [vmem:[%s1798_s2] ss:$0 sm:$0xff] (!%p242_p10) }
  0x14   : > { %v1270_v11 = vpack.c.bf16 (!%p242_p10), %v529_v10, %v528_v9  ;;  %1261 = vmatpush3.bf16.msra.mxu0 (!%p242_p10), %v1258_v3  ;;  %v1648_v29 = vld [vmem:[%s1800_s4] ss:$0 sm:$0xff] (!%p242_p10)  ;;  %s1071_s19 = sshll.u32 (!%p242_p10), %s1429_s25, 5  ;;  %s1443_s17 = smov (!%p242_p10), [#allocation2]  }
  0x15   : > { %1267 = vmatprep.subr.bf16.mxu1 (!%p242_p10), %v1266_v7  ;;  %1263 = vmatprep.subr.bf16.mxu0 (!%p242_p10), %v1262_v8  ;;  %s865_s20 = sadd.s32 (!%p242_p10), %s1071_s19, %s1562_s30  ;;  %s1351_s19 = sshll.u32 (!%p242_p10), %s1443_s17, 4  ;;  %s1352_s19 = int_to_ptr.vmem [resolvable:$false] %s1351_s19 }
  0x16   : > { %1269 = vmatpush3.bf16.msra.mxu1 (!%p242_p10), %v1266_v7 }
  0x17   : > { %1271 = vmatprep.subr.bf16.mxu1 (!%p242_p10), %v1270_v11 }
  0x18   : > { %s286_s29 = scalar_select %p285_p12, %s1429_s25, 1  ;;  %1265 = vmatpush3.bf16.msra.mxu0 %v1262_v8 }
  0x19   : > { %s288_s9 = scalar_select %p287_p13, %s1562_s30, 31 }
  0x1a   : > { %s998_s12 = sshll.u32 %s286_s29, 5  ;;  %1273 = vmatpush3.bf16.msra.mxu1 %v1270_v11  ;;  %s1072_s25 = sshll.u32 %s865_s20, 6 }
  0x1b   : > { %s1583_s13 = sadd.s32 %s998_s12, %s288_s9  ;;  %s1353_s20 = scalar_lea.vmem %s1352_s19, 2048 }
  0x1c   : > { %s999_s14 = sshll.u32 %s1583_s13, 3  ;;  %s1002_s12 = sshll.u32 %s1583_s13, 2 }
  0x1d   : > { %s1589_s24 = scalar_lea.vmem %s1796_s0, %s999_s14  ;;  %s996_s14 = sshll.u32 %s270_s18, 6 }
  0x1e   : > { %v305_v12 = vld [vmem:[%s1589_s24] sm:$0xff]  ;;  %v306_v13 = vld [vmem:[%s1589_s24 + $0x8] sm:$0xff]  ;;  %v307_v14 = vld [vmem:[%s1589_s24 + $0x10] sm:$0xff]  ;;  %s1665_s13 = scalar_lea.vmem [#allocation2], %s996_s14  ;;  %s1744_s14 = scalar_lea.sflag [#allocation3], %s270_s18 }
  0x1f   : > { %1202 = vmatprep.mubr.msk.f32.mxu0 %vm332_vm0, %v305_v12  ;;  %1234 = vmatprep.mubr.msk.f32.mxu1 %vm332_vm0, %v305_v12  ;;  %v308_v15 = vld [vmem:[%s1589_s24 + $0x18] sm:$0xff]  ;;  %v309_v16 = vld [vmem:[%s1589_s24 + $0x20] sm:$0xff]  ;;  %v310_v17 = vld [vmem:[%s1589_s24 + $0x28] sm:$0xff]  ;;  %s868_s30 = sshll.u32 %s1665_s13, 4  ;;  %s1735_s30 = int_to_ptr.vmem [resolvable:$true] %s868_s30 }
  0x20   : > { %1203 = vmatmul.mubr.msk.f32.vlgmr.msra.gmra.mrb[0].mxu0 %vm332_vm0, %v306_v13  ;;  %1235 = vmatmul.mubr.msk.f32.vlgmr.msra.gmra.mrb[0].mxu1 %vm332_vm0, %v306_v13  ;;  %v311_v18 = vld [vmem:[%s1589_s24 + $0x30] sm:$0xff]  ;;  %v312_v19 = vld [vmem:[%s1589_s24 + $0x38] sm:$0xff]  ;;  %v313_v20 = vld [vmem:[%s1589_s24 + $0x40] sm:$0xff]  ;;  %s1347_s16 = scalar_lea.vmem %s1735_s30, 1024  ;;  %p1354_p4 = scmp.lt.s32.totalorder %s1735_s30, %s1352_s19 }
  0x21   : > { %1205 = vmatprep.mubr.msk.f32.mxu0 %vm332_vm0, %v307_v14  ;;  %1237 = vmatprep.mubr.msk.f32.mxu1 %vm332_vm0, %v307_v14  ;;  %v314_v21 = vld [vmem:[%s1589_s24 + $0x48] sm:$0xff]  ;;  %v315_v22 = vld [vmem:[%s1589_s24 + $0x50] sm:$0xff]  ;;  %v316_v23 = vld [vmem:[%s1589_s24 + $0x58] sm:$0xff]  ;;  %p1348_p0 = scmp.ne.s32.totalorder %s1735_s30, %s1347_s16  ;;  %p1355_p5 = scmp.lt.s32.totalorder %s1353_s20, %s1347_s16 }
  0x22   : > { %v317_v24 = vld [vmem:[%s1589_s24 + $0x60] sm:$0xff]  ;;  %v318_v25 = vld [vmem:[%s1589_s24 + $0x68] sm:$0xff]  ;;  %v319_v26 = vld [vmem:[%s1589_s24 + $0x70] sm:$0xff] }
  0x23   : > { %v320_v27 = vld [vmem:[%s1589_s24 + $0x78] sm:$0xff]  ;;  %s1659_s24 = scalar_lea.vmem %s1802_s6, %s1002_s12  ;;  %s1733_s12 = scalar_lea.hbm %s1801_s5, %s1072_s25 }
  0x24   : > { %1206 = vmatmul.mubr.msk.f32.gmra.mrb[2].mxu0 %vm332_vm0, %v308_v15  ;;  %1238 = vmatmul.mubr.msk.f32.gmra.mrb[2].mxu1 %vm332_vm0, %v308_v15  ;;  %p1349_p1 = pnand %p1348_p0, %p1532_p3  ;;  %p1356_p6 = por %p1355_p5, %p1354_p4 }
  0x25   : > { %1208 = vmatprep.mubr.msk.f32.mxu0 %vm332_vm0, %v309_v16  ;;  %1240 = vmatprep.mubr.msk.f32.mxu1 %vm332_vm0, %v309_v16 }
  0x26   : > { %p1350_p2 = pneg %p1349_p1 }
  0x28   : > { %1209 = vmatmul.mubr.msk.f32.gmra.mrb[4].mxu0 %vm332_vm0, %v310_v17  ;;  %1241 = vmatmul.mubr.msk.f32.gmra.mrb[4].mxu1 %vm332_vm0, %v310_v17  ;;  %p1357_p7 = pnand %p1356_p6, %p1350_p2 }
  0x29   : > { %1211 = vmatprep.mubr.msk.f32.mxu0 %vm332_vm0, %v311_v18  ;;  %1243 = vmatprep.mubr.msk.f32.mxu1 %vm332_vm0, %v311_v18 }
  0x2c   : > { %1212 = vmatmul.mubr.msk.f32.gmra.mrb[6].mxu0 %vm332_vm0, %v312_v19  ;;  %1244 = vmatmul.mubr.msk.f32.gmra.mrb[6].mxu1 %vm332_vm0, %v312_v19 }
  0x2d   : > { %1214 = vmatprep.mubr.msk.f32.mxu0 %vm332_vm0, %v313_v20  ;;  %1246 = vmatprep.mubr.msk.f32.mxu1 %vm332_vm0, %v313_v20 }
  0x30   : > { %1215 = vmatmul.mubr.msk.f32.gmra.mrb[8].mxu0 %vm332_vm0, %v314_v21  ;;  %1247 = vmatmul.mubr.msk.f32.gmra.mrb[8].mxu1 %vm332_vm0, %v314_v21 }
  0x31   : > { %1217 = vmatprep.mubr.msk.f32.mxu0 %vm332_vm0, %v315_v22  ;;  %1249 = vmatprep.mubr.msk.f32.mxu1 %vm332_vm0, %v315_v22 }
  0x34   : > { %1218 = vmatmul.mubr.msk.f32.gmra.mrb[10].mxu0 %vm332_vm0, %v316_v23  ;;  %1250 = vmatmul.mubr.msk.f32.gmra.mrb[10].mxu1 %vm332_vm0, %v316_v23 }
  0x35   : > { %1220 = vmatprep.mubr.msk.f32.mxu0 %vm332_vm0, %v317_v24  ;;  %1252 = vmatprep.mubr.msk.f32.mxu1 %vm332_vm0, %v317_v24 }
  0x38   : > { %1221 = vmatmul.mubr.msk.f32.gmra.mrb[12].mxu0 %vm332_vm0, %v318_v25  ;;  %1253 = vmatmul.mubr.msk.f32.gmra.mrb[12].mxu1 %vm332_vm0, %v318_v25 }
  0x39   : > { %1223 = vmatprep.mubr.msk.f32.mxu0 %vm332_vm0, %v319_v26  ;;  %1255 = vmatprep.mubr.msk.f32.mxu1 %vm332_vm0, %v319_v26 }
  0x3c   : > { %1224 = vmatmul.mubr.msk.f32.gmra.mrb[14].mxu0 %vm332_vm0, %v320_v27  ;;  %1256 = vmatmul.mubr.msk.f32.gmra.mrb[14].mxu1 %vm332_vm0, %v320_v27 }
  0xf3   : > { %v1204_v30 = vpop.f32.mrb[0].mxu0  ;;  %v1236_v32 = vpop.f32.mrb[0].mxu1 }
  0xf4   : > { %v453_v31 = vadd.f32 %v1204_v30, %v1643_v28  ;;  %v447_v33 = vpop.f32.mrb[1].mxu0  ;;  %v609_v34 = vadd.f32 %v1236_v32, %v1648_v29  ;;  %v603_v36 = vpop.f32.mrb[1].mxu1 }
  0xf5   : > { %v448_v35 = vadd.f32 %v1643_v28, %v447_v33  ;;  %v604_v37 = vadd.f32 %v1648_v29, %v603_v36 }
  0xf6   : > { %v1092_v38 = vpack.c.bf16 %v609_v34, %v609_v34 }
  0xf7   : > { %v1110_v39 = vpack.c.bf16 %v453_v31, %v448_v35  ;;  %v1207_v40 = vpop.f32.mrb[2].mxu0  ;;  %v1091_v41 = vpack.c.bf16 %v604_v37, %v604_v37  ;;  %v1239_v43 = vpop.f32.mrb[2].mxu1 }
  0xf8   : > { %v463_v42 = vadd.f32 %v1207_v40, %v1643_v28  ;;  %v457_v44 = vpop.f32.mrb[3].mxu0  ;;  %828 = vst.msk [vmem:[%s1659_s24 + $0x4] sm:$0xf] %vm826_vm1, %v1092_v38  ;;  %v619_v45 = vadd.f32 %v1239_v43, %v1648_v29  ;;  %v613_v47 = vpop.f32.mrb[3].mxu1 }
  0xf9   : > { %1111 = vst [vmem:[%s1665_s13] sm:$0xff] %v1110_v39   ;;  %v458_v46 = vadd.f32 %v1643_v28, %v457_v44  ;;  %827 = vst.msk [vmem:[%s1659_s24] sm:$0xf] %vm826_vm1, %v1091_v41  ;;  %v614_v48 = vadd.f32 %v1648_v29, %v613_v47 }
  0xfa   : > { %v1094_v49 = vpack.c.bf16 %v619_v45, %v619_v45 }
  0xfb   : > { %v1115_v50 = vpack.c.bf16 %v463_v42, %v458_v46  ;;  %v1210_v51 = vpop.f32.mrb[4].mxu0  ;;  %v1093_v52 = vpack.c.bf16 %v614_v48, %v614_v48  ;;  %v1242_v54 = vpop.f32.mrb[4].mxu1 }
  0xfc   : > { %v473_v53 = vadd.f32 %v1210_v51, %v1643_v28  ;;  %v467_v55 = vpop.f32.mrb[5].mxu0  ;;  %830 = vst.msk [vmem:[%s1659_s24 + $0xc] sm:$0xf] %vm826_vm1, %v1094_v49  ;;  %v629_v56 = vadd.f32 %v1242_v54, %v1648_v29  ;;  %v623_v58 = vpop.f32.mrb[5].mxu1 }
  0xfd   : > { %1147 = vst [vmem:[%s1665_s13 + $0x8] sm:$0xff] %v1115_v50   ;;  %v468_v57 = vadd.f32 %v1643_v28, %v467_v55  ;;  %829 = vst.msk [vmem:[%s1659_s24 + $0x8] sm:$0xf] %vm826_vm1, %v1093_v52  ;;  %v624_v59 = vadd.f32 %v1648_v29, %v623_v58 }
  0xfe   : > { %v1096_v60 = vpack.c.bf16 %v629_v56, %v629_v56 }
  0xff   : > { %v1120_v61 = vpack.c.bf16 %v473_v53, %v468_v57  ;;  %v1213_v62 = vpop.f32.mrb[6].mxu0  ;;  %v1095_v63 = vpack.c.bf16 %v624_v59, %v624_v59  ;;  %v1245_v1 = vpop.f32.mrb[6].mxu1 }
 0x100   : > { %v483_v0 = vadd.f32 %v1213_v62, %v1643_v28  ;;  %v477_v2 = vpop.f32.mrb[7].mxu0  ;;  %832 = vst.msk [vmem:[%s1659_s24 + $0x14] sm:$0xf] %vm826_vm1, %v1096_v60  ;;  %v639_v3 = vadd.f32 %v1245_v1, %v1648_v29  ;;  %v633_v5 = vpop.f32.mrb[7].mxu1 }
 0x101   : > { %1148 = vst [vmem:[%s1665_s13 + $0x10] sm:$0xff] %v1120_v61   ;;  %v478_v4 = vadd.f32 %v1643_v28, %v477_v2  ;;  %831 = vst.msk [vmem:[%s1659_s24 + $0x10] sm:$0xf] %vm826_vm1, %v1095_v63  ;;  %v634_v6 = vadd.f32 %v1648_v29, %v633_v5 }
 0x102   : > { %v1098_v7 = vpack.c.bf16 %v639_v3, %v639_v3 }
 0x103   : > { %v1125_v8 = vpack.c.bf16 %v483_v0, %v478_v4  ;;  %v1216_v9 = vpop.f32.mrb[8].mxu0  ;;  %v1097_v10 = vpack.c.bf16 %v634_v6, %v634_v6  ;;  %v1248_v12 = vpop.f32.mrb[8].mxu1 }
 0x104   : > { %v493_v11 = vadd.f32 %v1216_v9, %v1643_v28  ;;  %v487_v13 = vpop.f32.mrb[9].mxu0  ;;  %834 = vst.msk [vmem:[%s1659_s24 + $0x1c] sm:$0xf] %vm826_vm1, %v1098_v7  ;;  %v649_v14 = vadd.f32 %v1248_v12, %v1648_v29  ;;  %v643_v16 = vpop.f32.mrb[9].mxu1 }
 0x105   : > { %1149 = vst [vmem:[%s1665_s13 + $0x18] sm:$0xff] %v1125_v8   ;;  %v488_v15 = vadd.f32 %v1643_v28, %v487_v13  ;;  %833 = vst.msk [vmem:[%s1659_s24 + $0x18] sm:$0xf] %vm826_vm1, %v1097_v10  ;;  %v644_v17 = vadd.f32 %v1648_v29, %v643_v16 }
 0x106   : > { %v1100_v18 = vpack.c.bf16 %v649_v14, %v649_v14 }
 0x107   : > { %v1130_v19 = vpack.c.bf16 %v493_v11, %v488_v15  ;;  %v1219_v20 = vpop.f32.mrb[10].mxu0  ;;  %v1099_v21 = vpack.c.bf16 %v644_v17, %v644_v17  ;;  %v1251_v23 = vpop.f32.mrb[10].mxu1 }
 0x108   : > { %v503_v22 = vadd.f32 %v1219_v20, %v1643_v28  ;;  %v497_v24 = vpop.f32.mrb[11].mxu0  ;;  %836 = vst.msk [vmem:[%s1659_s24 + $0x24] sm:$0xf] %vm826_vm1, %v1100_v18  ;;  %v659_v25 = vadd.f32 %v1251_v23, %v1648_v29  ;;  %v653_v27 = vpop.f32.mrb[11].mxu1 }
 0x109   : > { %1150 = vst [vmem:[%s1665_s13 + $0x20] sm:$0xff] %v1130_v19   ;;  %v498_v26 = vadd.f32 %v1643_v28, %v497_v24  ;;  %835 = vst.msk [vmem:[%s1659_s24 + $0x20] sm:$0xf] %vm826_vm1, %v1099_v21  ;;  %v654_v30 = vadd.f32 %v1648_v29, %v653_v27 }
 0x10a   : > { %v1102_v31 = vpack.c.bf16 %v659_v25, %v659_v25 }
 0x10b   : > { %v1135_v32 = vpack.c.bf16 %v503_v22, %v498_v26  ;;  %v1222_v33 = vpop.f32.mrb[12].mxu0  ;;  %v1101_v34 = vpack.c.bf16 %v654_v30, %v654_v30  ;;  %v1254_v36 = vpop.f32.mrb[12].mxu1 }
 0x10c   : > { %v513_v35 = vadd.f32 %v1222_v33, %v1643_v28  ;;  %v507_v37 = vpop.f32.mrb[13].mxu0  ;;  %838 = vst.msk [vmem:[%s1659_s24 + $0x2c] sm:$0xf] %vm826_vm1, %v1102_v31  ;;  %v669_v38 = vadd.f32 %v1254_v36, %v1648_v29  ;;  %v663_v40 = vpop.f32.mrb[13].mxu1 }
 0x10d   : > { %1151 = vst [vmem:[%s1665_s13 + $0x28] sm:$0xff] %v1135_v32   ;;  %v508_v39 = vadd.f32 %v1643_v28, %v507_v37  ;;  %837 = vst.msk [vmem:[%s1659_s24 + $0x28] sm:$0xf] %vm826_vm1, %v1101_v34  ;;  %v664_v41 = vadd.f32 %v1648_v29, %v663_v40 }
 0x10e   : > { %v1104_v42 = vpack.c.bf16 %v669_v38, %v669_v38 }
 0x10f   : > { %v1140_v43 = vpack.c.bf16 %v513_v35, %v508_v39  ;;  %v1225_v44 = vpop.f32.mrb[14].mxu0  ;;  %v1103_v45 = vpack.c.bf16 %v664_v41, %v664_v41  ;;  %v1257_v47 = vpop.f32.mrb[14].mxu1 }
 0x110   : > { %v523_v46 = vadd.f32 %v1225_v44, %v1643_v28  ;;  %v517_v48 = vpop.f32.mrb[15].mxu0  ;;  %840 = vst.msk [vmem:[%s1659_s24 + $0x34] sm:$0xf] %vm826_vm1, %v1104_v42  ;;  %v679_v49 = vadd.f32 %v1257_v47, %v1648_v29  ;;  %v673_v51 = vpop.f32.mrb[15].mxu1 }
 0x111   : > { %1152 = vst [vmem:[%s1665_s13 + $0x30] sm:$0xff] %v1140_v43   ;;  %v518_v50 = vadd.f32 %v1643_v28, %v517_v48  ;;  %839 = vst.msk [vmem:[%s1659_s24 + $0x30] sm:$0xf] %vm826_vm1, %v1103_v45  ;;  %v674_v52 = vadd.f32 %v1648_v29, %v673_v51 }
 0x112   : > { %v1106_v53 = vpack.c.bf16 %v679_v49, %v679_v49 }
 0x113   : > { %v1145_v54 = vpack.c.bf16 %v523_v46, %v518_v50  ;;  %v1105_v55 = vpack.c.bf16 %v674_v52, %v674_v52 }
 0x114   : > { %842 = vst.msk [vmem:[%s1659_s24 + $0x3c] sm:$0xf] %vm826_vm1, %v1106_v53 }
 0x115   : > { %1153 = vst [vmem:[%s1665_s13 + $0x38] sm:$0xff] %v1145_v54   ;;  %841 = vst.msk [vmem:[%s1659_s24 + $0x38] sm:$0xf] %vm826_vm1, %v1105_v55 }
 0x116   : > { %1360 = shalt.err (!%p1357_p7)
}
 0x117   : > { %s1361_s18 = scalar_lea.hbm %s1733_s12, 1024  ;;  %s1365_s25 = scalar_lea.hbm %s1801_s5, 4096 }
 0x118   : > { %p1362_p9 = scmp.ne.s32.totalorder %s1733_s12, %s1361_s18  ;;  %p1366_p12 = scmp.lt.u32.totalorder %s1733_s12, %s1801_s5 }
 0x119   : > { %p1367_p13 = scmp.lt.u32.totalorder %s1365_s25, %s1361_s18  ;;  %p1369_p1 = scmp.lt.u32.totalorder %s1361_s18, %s1733_s12 }
 0x11a   : > { %p1363_p10 = pnand %p1362_p9, %p1532_p3 }
 0x11b   : > { %p1368_p0 = por %p1367_p13, %p1366_p12 }
 0x11c   : > { %p1364_p11 = pneg %p1363_p10 }
 0x11d   : > { %p1370_p2 = por %p1369_p1, %p1368_p0 }
 0x11f   : > { %p1371_p4 = pnand %p1370_p2, %p1364_p11 }
 0x121   : > { %1374 = shalt.err (!%p1371_p4)
}
 0x122   : > { %s1444_s16 = smov 64   ;;  %s1445_s17 = smov 4  }
 0x123   : > { %1274 = dma.vmem_to_hbm [thread:$0]  (%p1532_p3), %s1735_s30, 1024, %s1733_s12, %s1744_s14, %s1444_s16, %s1444_s16, %s1445_s17  }
 0x124 PF: > { %p1280_p5 = scmp.ge.s32.totalorder %s1441_s28, 2  ;;  %s887_s19 = sand.u32 1, %s1413_s21  }
 0x125   : > { %s888_s20 = scalar_lea.sflag [#allocation3], %s887_s19 }
 0x126   : > { %p1277_p6 = pnand %p1280_p5, %p1541_p8 }
 0x128   : > { %1408 = dma.done.wait (!%p1277_p6), %s888_s20, 1024  }
 0x129   : > { %1410 = vsyncadd (!%p1277_p6), %s888_s20, 4294966272  ;;  %s20_s28 = sadd.s32 1, %s1441_s28   ;;  %s1805_s21 = smov %s1417_s22 }
 0x12a   : > { %p17_p7 = scmp.ge.s32.totalorder %s20_s28, 6   ;;  %s1806_s22 = smov %s1421_s23 }
 0x12b   : > { %s1807_s23 = smov %s1550_s15  ;;  %s1808_s24 = smov %s1433_s26 }
 0x12c   : > { %s1809_s25 = smov %s1437_s27  ;;  %s1810_s26 = smov %s1813_s7 }
 0x12d   : > { %s1811_s27 = smov %s1817_s8  ;;  %19 = sbr.rel (!%p17_p7) target bundleno = 5 (0x5), region = 87 }
 0x134   :  { %905 = vsyncpa [#allocation3], 1 }
 0x135   :  { %907 = vsyncpa [#allocation3 + $0x1], 1 }

</bundles_post_ra>
